<compile_context>
chip_gen: v5e
topology: v5e:2x2
jax: 0.10.0
libtpu: 0.0.40
codegen_flags: <defaults>
</compile_context>

<pallas_src>
import functools

import jax
import jax.numpy as jnp
from jax.experimental import pallas as pl
from jax.experimental.pallas import tpu as pltpu

EPS = 1e-6


def residual_kernel(seed_ref, x_ref, w_ref, b_ref, o_ref,
                    *, dropout_p, training, mxu_dtype):
    x = x_ref[...].astype(jnp.float32)               # (br, F)
    br, f = x.shape

    # --- LayerNormalization (mean / unbiased std over last dim) ---
    mean = jnp.mean(x, axis=-1, keepdims=True)
    centered = x - mean
    var = jnp.sum(centered * centered, axis=-1, keepdims=True) / (f - 1)
    inv_std = 1.0 / (jnp.sqrt(var) + EPS)            # one reciprocal per row
    normed = centered * inv_std                      # affine folded into W/b

    # --- sublayer: Linear(features, features) on the MXU (bf16 in, f32 acc) ---
    y = jnp.dot(normed.astype(mxu_dtype), w_ref[...].astype(mxu_dtype),
                preferred_element_type=jnp.float32)
    y = y + b_ref[...]

    # --- dropout (inverted dropout), portable stateless hash PRNG ---
    # TODO(synk): mask stream is not bitwise-identical to torch.nn.Dropout.
    if training and dropout_p > 0.0:
        row = jax.lax.broadcasted_iota(jnp.int32, (br, f), 0)
        col = jax.lax.broadcasted_iota(jnp.int32, (br, f), 1)
        gid = ((pl.program_id(0) * br + row) * f + col).astype(jnp.uint32)
        seed_u = seed_ref[0].astype(jnp.uint32) * jnp.uint32(0x9E3779B9)
        h = gid ^ seed_u                              # lowbias32 mix
        h = h ^ (h >> 16)
        h = h * jnp.uint32(0x7FEB352D)
        h = h ^ (h >> 15)
        h = h * jnp.uint32(0x846CA68B)
        h = h ^ (h >> 16)
        threshold = jnp.uint32(int(round(dropout_p * (1 << 24))))
        keep = (h >> 8) >= threshold                  # P(drop) ~= dropout_p
        y = jnp.where(keep, y * (1.0 / (1.0 - dropout_p)), 0.0)

    # --- residual add ---
    o_ref[...] = (x + y).astype(o_ref.dtype)


def residual_connection(x, alpha, beta, w, b, seed, *, dropout_p=0.1,
                        training=True, block_rows=512,
                        mxu_dtype=jnp.bfloat16):
    B, S, F = x.shape
    rows = B * S
    x2 = x.reshape(rows, F)

    # Fold the LayerNorm affine into the Linear sublayer (exact algebra, f32):
    #   alpha*(n) @ W + (beta @ W + b)  ==  n @ (diag(alpha) @ W) + (beta@W + b)
    w_eff = (w * alpha.reshape(F, 1)).astype(jnp.float32)
    b_eff = (beta @ w + b).astype(jnp.float32)        # (1, F)

    # Row-block sizing: big tiles for MXU/M and DMA efficiency, padded so the
    # grid divides evenly.  (VMEM footprint at F=128 is tiny; no limit bump.)
    br = min(block_rows, rows)
    br = max(8, (br // 8) * 8)
    padded = pl.cdiv(rows, br) * br
    if padded != rows:
        x2 = jnp.pad(x2, ((0, padded - rows), (0, 0)))

    kernel = functools.partial(residual_kernel, dropout_p=float(dropout_p),
                               training=training, mxu_dtype=mxu_dtype)

    out = pl.pallas_call(
        kernel,
        out_shape=jax.ShapeDtypeStruct((padded, F), x.dtype),
        grid_spec=pltpu.PrefetchScalarGridSpec(
            num_scalar_prefetch=1,                     # seed lands in SMEM
            grid=(padded // br,),
            in_specs=[
                pl.BlockSpec((br, F), lambda i, s: (i, 0)),   # x rows
                pl.BlockSpec((F, F),  lambda i, s: (0, 0)),   # folded W
                pl.BlockSpec((1, F),  lambda i, s: (0, 0)),   # folded bias
            ],
            out_specs=pl.BlockSpec((br, F), lambda i, s: (i, 0)),
        ),
        compiler_params=pltpu.CompilerParams(
            dimension_semantics=("parallel",)),
    )(seed, x2, w_eff, b_eff)

    return out[:rows].reshape(B, S, F)


def _ref_no_dropout(x, alpha, beta, w, b, mxu_dtype=None):
    """Pure-JAX reference for the training=False (dropout = identity) path."""
    f = x.shape[-1]
    mean = jnp.mean(x, axis=-1, keepdims=True)
    centered = x - mean
    var = jnp.sum(centered * centered, axis=-1, keepdims=True) / (f - 1)
    std = jnp.sqrt(var)
    normed = alpha * (centered / (std + EPS)) + beta
    if mxu_dtype is not None:
        y = jnp.dot(normed.astype(mxu_dtype), w.astype(mxu_dtype),
                    preferred_element_type=jnp.float32) + b
    else:
        y = normed @ w + b
    return x + y


if __name__ == "__main__":
    key = jax.random.PRNGKey(0)
    k_x, k_w, k_a, k_be = jax.random.split(key, 4)

    B, S, F = 2, 8, 128          # batch=2, seq=8, features=128
    dropout_p = 0.1

    x = jax.random.normal(k_x, (B, S, F), dtype=jnp.float32)

    # Parameters (shapes from __init__); non-trivial alpha/beta so the
    # affine-folding path is actually exercised.
    alpha = 1.0 + 0.1 * jax.random.normal(k_a, (1, F), dtype=jnp.float32)
    beta = 0.1 * jax.random.normal(k_be, (1, F), dtype=jnp.float32)
    w = (jax.random.normal(k_w, (F, F), dtype=jnp.float32)
         * (1.0 / jnp.sqrt(jnp.float32(F))))           # sublayer Linear weight
    b = jnp.zeros((1, F), dtype=jnp.float32)            # sublayer Linear bias
    seed = jnp.array([42], dtype=jnp.int32)             # dropout PRNG seed

    # Eval path, f32 MXU — tight check against the pure-JAX reference.
    out_eval_f32 = residual_connection(x, alpha, beta, w, b, seed,
                                       dropout_p=dropout_p, training=False,
                                       mxu_dtype=jnp.float32)
    jax.block_until_ready(out_eval_f32)
    ref_f32 = _ref_no_dropout(x, alpha, beta, w, b)
    assert jnp.allclose(out_eval_f32, ref_f32, rtol=1e-4, atol=1e-4), \
        "f32 eval path mismatch vs reference"

    # Eval path, bf16 MXU inputs (default / optimized) — loose check.
    out_eval_bf16 = residual_connection(x, alpha, beta, w, b, seed,
                                        dropout_p=dropout_p, training=False)
    jax.block_until_ready(out_eval_bf16)
    assert jnp.allclose(out_eval_bf16, ref_f32, rtol=5e-2, atol=5e-2), \
        "bf16 eval path mismatch vs reference"

    # Training path (dropout active inside the kernel).
    out_train = residual_connection(x, alpha, beta, w, b, seed,
                                    dropout_p=dropout_p, training=True)
    jax.block_until_ready(out_train)
    assert out_train.shape == x.shape
    assert bool(jnp.all(jnp.isfinite(out_train)))
    drop_frac = jnp.mean((out_train == x).astype(jnp.float32))
    assert 0.01 < float(drop_frac) < 0.3, "dropout rate far from expected"

    print("KERNEL_OK")
</pallas_src>

<mosaic_0001>
module attributes {stable_mosaic.version = 11 : i64} {
  func.func @residual_kernel(%arg0: i32, %arg1: memref<1xi32, #tpu.memory_space<smem>>, %arg2: memref<16x128xf32, #tpu.memory_space<vmem>>, %arg3: memref<128x128xf32, #tpu.memory_space<vmem>>, %arg4: memref<1x128xf32, #tpu.memory_space<vmem>>, %arg5: memref<16x128xf32, #tpu.memory_space<vmem>>) attributes {dimension_semantics = [#tpu.dimension_semantics<parallel>], iteration_bounds = array<i64: 1>, scalar_prefetch = 1 : i64, scratch_operands = 0 : i64, tpu.core_type = #tpu.core_type<tc>, window_params = [{transform_indices = @transform_0, window_bounds = array<i64: 16, 128>}, {pipeline_mode = #tpu.pipeline_mode<synchronous>, transform_indices = @transform_1, window_bounds = array<i64: 128, 128>}, {pipeline_mode = #tpu.pipeline_mode<synchronous>, transform_indices = @transform_2, window_bounds = array<i64: 1, 128>}, {transform_indices = @transform_3, window_bounds = array<i64: 16, 128>}]} {
    %c0 = arith.constant 0 : index
    %c0_0 = arith.constant 0 : index
    %0 = vector.load %arg2[%c0, %c0_0] : memref<16x128xf32, #tpu.memory_space<vmem>>, vector<16x128xf32>
    %cst = arith.constant dense<0.000000e+00> : vector<16xf32>
    %1 = vector.multi_reduction <add>, %0, %cst [1] : vector<16x128xf32> to vector<16xf32>
    %2 = vector.shape_cast %1 : vector<16xf32> to vector<16x1xf32>
    %cst_1 = arith.constant 1.280000e+02 : f32
    %3 = vector.broadcast %cst_1 : f32 to vector<16x1xf32>
    %4 = arith.divf %2, %3 : vector<16x1xf32>
    %5 = vector.broadcast %4 : vector<16x1xf32> to vector<16x128xf32>
    %6 = arith.subf %0, %5 : vector<16x128xf32>
    %7 = arith.mulf %6, %6 : vector<16x128xf32>
    %cst_2 = arith.constant dense<0.000000e+00> : vector<16xf32>
    %8 = vector.multi_reduction <add>, %7, %cst_2 [1] : vector<16x128xf32> to vector<16xf32>
    %9 = vector.shape_cast %8 : vector<16xf32> to vector<16x1xf32>
    %cst_3 = arith.constant 1.270000e+02 : f32
    %10 = vector.broadcast %cst_3 : f32 to vector<16x1xf32>
    %11 = arith.divf %9, %10 : vector<16x1xf32>
    %12 = math.sqrt %11 : vector<16x1xf32>
    %cst_4 = arith.constant 9.99999997E-7 : f32
    %13 = vector.broadcast %cst_4 : f32 to vector<16x1xf32>
    %14 = arith.addf %12, %13 : vector<16x1xf32>
    %cst_5 = arith.constant 1.000000e+00 : f32
    %15 = vector.broadcast %cst_5 : f32 to vector<16x1xf32>
    %16 = arith.divf %15, %14 : vector<16x1xf32>
    %17 = vector.broadcast %16 : vector<16x1xf32> to vector<16x128xf32>
    %18 = arith.mulf %6, %17 : vector<16x128xf32>
    %c0_6 = arith.constant 0 : index
    %c0_7 = arith.constant 0 : index
    %19 = vector.load %arg3[%c0_6, %c0_7] : memref<128x128xf32, #tpu.memory_space<vmem>>, vector<128x128xf32>
    %cst_8 = arith.constant dense<0.000000e+00> : vector<16x128xf32>
    %20 = tpu.matmul %18, %19, %cst_8 {dimension_numbers = #tpu.dot_dimension_numbers<[1], [0], [0], [1], [0, 0, 1, 1], [], []>} : vector<16x128xf32>, vector<128x128xf32>, vector<16x128xf32> -> vector<16x128xf32>
    %c0_9 = arith.constant 0 : index
    %c0_10 = arith.constant 0 : index
    %21 = vector.load %arg4[%c0_9, %c0_10] : memref<1x128xf32, #tpu.memory_space<vmem>>, vector<1x128xf32>
    %22 = vector.broadcast %21 : vector<1x128xf32> to vector<16x128xf32>
    %23 = arith.addf %20, %22 : vector<16x128xf32>
    %24 = arith.addf %0, %23 : vector<16x128xf32>
    %c0_11 = arith.constant 0 : index
    %c0_12 = arith.constant 0 : index
    %25 = vector.load %arg5[%c0_11, %c0_12] : memref<16x128xf32, #tpu.memory_space<vmem>>, vector<16x128xf32>
    tpu.vector_store %arg5[%c0_11, %c0_12], %24 {strides = array<i32>} : memref<16x128xf32, #tpu.memory_space<vmem>>, vector<16x128xf32>,
    return
  }
  func.func @transform_0(%arg0: i32, %arg1: memref<1xi32, #tpu.memory_space<smem>>) -> (i32, i32) {
    %c0_i32 = arith.constant 0 : i32
    %c0_i32_0 = arith.constant 0 : i32
    return %arg0, %c0_i32 : i32, i32
  }
  func.func @transform_1(%arg0: i32, %arg1: memref<1xi32, #tpu.memory_space<smem>>) -> (i32, i32) {
    %c0_i32 = arith.constant 0 : i32
    %c0_i32_0 = arith.constant 0 : i32
    %c0_i32_1 = arith.constant 0 : i32
    return %c0_i32, %c0_i32_0 : i32, i32
  }
  func.func @transform_2(%arg0: i32, %arg1: memref<1xi32, #tpu.memory_space<smem>>) -> (i32, i32) {
    %c0_i32 = arith.constant 0 : i32
    %c0_i32_0 = arith.constant 0 : i32
    %c0_i32_1 = arith.constant 0 : i32
    return %c0_i32, %c0_i32_0 : i32, i32
  }
  func.func @transform_3(%arg0: i32, %arg1: memref<1xi32, #tpu.memory_space<smem>>) -> (i32, i32) {
    %c0_i32 = arith.constant 0 : i32
    %c0_i32_0 = arith.constant 0 : i32
    return %arg0, %c0_i32 : i32, i32
  }
}

</mosaic_0001>

<bundles_post_ra>
// kernel: tpu_custom_call.1
= control target key start
LH: loop header
LB: loop body
LE: loop exit
PB: predicated region body
PF: predicated region fallthrough
CT: control target
= control target key end

     0   :  { %10 = vsyncpa [#allocation5], 0  ;;  %s393_s0 = inlined_call_operand.<no memory space> [shape: s32[1], index: 0, kind: input, shape index: {}]   ;;  %s394_s1 = inlined_call_operand.hbm [shape: f32[16,128], index: 1, kind: input, shape index: {}]   ;;  %s395_s2 = inlined_call_operand.hbm [shape: f32[128,128], index: 2, kind: input, shape index: {}]   ;;  %s396_s3 = inlined_call_operand.vmem [shape: f32[1,128], index: 3, kind: input, shape index: {}]   ;;  %s397_s4 = inlined_call_operand.hbm [shape: f32[16,128], index: 4, kind: output, shape index: {}]  }
   0x1   :  { %11 = vsyncpa [#allocation8], 0 }
   0x2   :  { %12 = vsyncpa [#allocation6], 0  ;;  %s17_s17 = sshll.u32 %s394_s1, 4  ;;  %s320_s0 = smov [#allocation4]   ;;  %s18_s17 = int_to_ptr.hbm [resolvable:$true] %s17_s17 }
   0x3   :  { %s19_s18 = sshll.u32 %s320_s0, 4  ;;  %s30_s21 = sshll.u32 %s395_s2, 4  ;;  %s20_s18 = int_to_ptr.vmem [resolvable:$true] %s19_s18  ;;  %s31_s21 = int_to_ptr.hbm [resolvable:$true] %s30_s21 }
   0x4   :  { %s321_s22 = smov 128   ;;  %s322_s23 = smov 8  }
   0x5   :  { %25 = dma.hbm_to_vmem [thread:$0]  %s18_s17, 256, %s20_s18, [#allocation5], %s321_s22, %s321_s22, %s322_s23  }
   0x6   :  { %s323_s24 = smov [#allocation7]  }
   0x7   :  { %s32_s25 = sshll.u32 %s323_s24, 4  ;;  %s33_s25 = int_to_ptr.vmem [resolvable:$true] %s32_s25 }
   0x8   :  { %38 = dma.hbm_to_vmem [thread:$0]  %s31_s21, 2048, %s33_s25, [#allocation8], %s321_s22, %s321_s22, %s322_s23  }
   0x9   :  { %314 = dma.done.wait [#allocation5], 256  }
   0xa   :  { %315 = vsyncadd [#allocation5], 4294967040 }
   0xb   :  { %316 = dma.done.wait [#allocation8], 2048  }
   0xc   :  { %317 = vsyncadd [#allocation8], 4294965248  ;;  %v364_v0 = vld [vmem:[#allocation4] sm:$0xff]  ;;  %v367_v1 = vld [vmem:[#allocation4 + $0x8] sm:$0xff]  ;;  %v324_v2 = vmov 128.0   ;;  %v325_v17 = vmov 127.0  }
   0xd   :  { %51 = vadd.xlane.f32.xlu0 %v364_v0  ;;  %230 = vrcp.f32 %v324_v2  ;;  %v154_v19 = vld [vmem:[#allocation7 + $0x78] sm:$0xff]  ;;  %v153_v21 = vld [vmem:[#allocation7 + $0x70] sm:$0xff]  ;;  %v152_v22 = vld [vmem:[#allocation7 + $0x68] sm:$0xff]  ;;  %s326_s26 = smov [#allocation9]   ;;  %s192_s30 = sshll.u32 %s397_s4, 4  ;;  %s193_s30 = int_to_ptr.hbm [resolvable:$true] %s192_s30 }
   0xe   :  { %232 = vrcp.f32 %v325_v17  ;;  %159 = vmatpush.msra.mxu0 %v154_v19  ;;  %206 = vmatpush.msra.mxu1 %v154_v19  ;;  %v151_v24 = vld [vmem:[#allocation7 + $0x60] sm:$0xff]  ;;  %v150_v25 = vld [vmem:[#allocation7 + $0x58] sm:$0xff]  ;;  %v149_v27 = vld [vmem:[#allocation7 + $0x50] sm:$0xff]  ;;  %s190_s27 = sshll.u32 %s326_s26, 4  ;;  %s191_s27 = int_to_ptr.vmem [resolvable:$true] %s190_s27 }
   0xf   :  { %v148_v28 = vld [vmem:[#allocation7 + $0x48] sm:$0xff]  ;;  %v147_v29 = vld [vmem:[#allocation7 + $0x40] sm:$0xff]  ;;  %v146_v31 = vld [vmem:[#allocation7 + $0x38] sm:$0xff] }
  0x10   :  { %160 = vmatpush.msra.mxu0 %v153_v21  ;;  %207 = vmatpush.msra.mxu1 %v153_v21  ;;  %v145_v32 = vld [vmem:[#allocation7 + $0x30] sm:$0xff]  ;;  %v144_v34 = vld [vmem:[#allocation7 + $0x28] sm:$0xff]  ;;  %v143_v37 = vld [vmem:[#allocation7 + $0x20] sm:$0xff] }
  0x11   :  { %v142_v38 = vld [vmem:[#allocation7 + $0x18] sm:$0xff]  ;;  %v141_v39 = vld [vmem:[#allocation7 + $0x10] sm:$0xff]  ;;  %v140_v40 = vld [vmem:[#allocation7 + $0x8] sm:$0xff] }
  0x12   :  { %161 = vmatpush.msra.mxu0 %v152_v22  ;;  %208 = vmatpush.msra.mxu1 %v152_v22  ;;  %v139_v44 = vld [vmem:[#allocation7] sm:$0xff] }
  0x13   :  { %v231_v3 = vpop.eup %230 }
  0x14   :  { %v56_v4 = vmul.f32 128.0, %v231_v3  ;;  %vm60_vm0 = vweird.f32 %v231_v3  ;;  %v233_v18 = vpop.eup %232  ;;  %162 = vmatpush.msra.mxu0 %v151_v24  ;;  %209 = vmatpush.msra.mxu1 %v151_v24 }
  0x15   :  { %53 = vadd.xlane.f32.xlu0 %v367_v1  ;;  %v73_v20 = vmul.f32 127.0, %v233_v18  ;;  %vm77_vm1 = vweird.f32 %v233_v18 }
  0x16   :  { %v57_v5 = vsub.f32 1.0, %v56_v4  ;;  %163 = vmatpush.msra.mxu0 %v150_v25  ;;  %210 = vmatpush.msra.mxu1 %v150_v25 }
  0x17   :  { %v74_v23 = vsub.f32 1.0, %v73_v20 }
  0x18   :  { %v58_v6 = vmul.f32 %v231_v3, %v57_v5  ;;  %164 = vmatpush.msra.mxu0 %v149_v27  ;;  %211 = vmatpush.msra.mxu1 %v149_v27 }
  0x19   :  { %v75_v26 = vmul.f32 %v233_v18, %v74_v23 }
  0x1a   :  { %v59_v7 = vadd.f32 %v231_v3, %v58_v6  ;;  %165 = vmatpush.msra.mxu0 %v148_v28  ;;  %212 = vmatpush.msra.mxu1 %v148_v28 }
  0x1b   :  { %v76_v30 = vadd.f32 %v233_v18, %v75_v26 }
  0x1c   :  { %v61_v8 = vsel %vm60_vm0, %v231_v3, %v59_v7  ;;  %166 = vmatpush.msra.mxu0 %v147_v29  ;;  %213 = vmatpush.msra.mxu1 %v147_v29 }
  0x1d   :  { %v78_v33 = vsel %vm77_vm1, %v233_v18, %v76_v30 }
  0x1e   :  { %167 = vmatpush.msra.mxu0 %v146_v31  ;;  %214 = vmatpush.msra.mxu1 %v146_v31 }
  0x20   :  { %168 = vmatpush.msra.mxu0 %v145_v32  ;;  %215 = vmatpush.msra.mxu1 %v145_v32 }
  0x22   :  { %169 = vmatpush.msra.mxu0 %v144_v34  ;;  %216 = vmatpush.msra.mxu1 %v144_v34 }
  0x24   :  { %170 = vmatpush.msra.mxu0 %v143_v37  ;;  %217 = vmatpush.msra.mxu1 %v143_v37 }
  0x26   :  { %171 = vmatpush.msra.mxu0 %v142_v38  ;;  %218 = vmatpush.msra.mxu1 %v142_v38 }
  0x28   :  { %172 = vmatpush.msra.mxu0 %v141_v39  ;;  %219 = vmatpush.msra.mxu1 %v141_v39 }
  0x2a   :  { %173 = vmatpush.msra.mxu0 %v140_v40  ;;  %220 = vmatpush.msra.mxu1 %v140_v40 }
  0x2c   :  { %174 = vmatpush.msra.mxu0 %v139_v44  ;;  %221 = vmatpush.msra.mxu1 %v139_v44 }
  0x80   :  { %v52_v9 = vpop.xlane.xlu0 %51 }
  0x81   :  { %v62_v10 = vmul.f32 %v61_v8, %v52_v9 }
  0x83   :  { %v371_v11 = vsub.f32 %v364_v0, %v62_v10 }
  0x85   :  { %v66_v12 = vmul.f32 %v371_v11, %v371_v11 }
  0x87   :  { %68 = vadd.xlane.f32.xlu1 %v66_v12 }
  0x88   :  { %v54_v13 = vpop.xlane.xlu0 %53 }
  0x89   :  { %v63_v14 = vmul.f32 %v61_v8, %v54_v13 }
  0x8b   :  { %v376_v15 = vsub.f32 %v367_v1, %v63_v14 }
  0x8d   :  { %v67_v16 = vmul.f32 %v376_v15, %v376_v15 }
  0x8f   :  { %70 = vadd.xlane.f32.xlu1 %v67_v16 }
  0xfa   :  { %v69_v35 = vpop.xlane.xlu1 %68 }
  0xfb   :  { %v79_v36 = vmul.f32 %v78_v33, %v69_v35 }
  0xfd   :  { %234 = vrsqrt.f32 %v79_v36  ;;  %vm88_vm2 = vcmp.eq.f32.partialorder %v79_v36, inf  ;;  %v91_v54 = vand.u32 2147483648, %v79_v36  ;;  %vm90_vm3 = vcmp.eq.f32.partialorder %v79_v36, 0.0 }
 0x102   :  { %v71_v41 = vpop.xlane.xlu1 %70 }
 0x103   :  { %v235_v42 = vpop.eup %234  ;;  %v80_v43 = vmul.f32 %v78_v33, %v71_v41 }
 0x104   :  { %v82_v45 = vmul.f32 %v235_v42, %v79_v36 }
 0x105   :  { %236 = vrsqrt.f32 %v80_v43  ;;  %vm100_vm4 = vcmp.eq.f32.partialorder %v80_v43, inf  ;;  %v103_v62 = vand.u32 2147483648, %v80_v43  ;;  %vm102_vm5 = vcmp.eq.f32.partialorder %v80_v43, 0.0 }
 0x106   :  { %v83_v46 = vmul.f32 %v235_v42, %v82_v45 }
 0x108   :  { %v84_v47 = vmul.f32 0.5, %v83_v46 }
 0x10a   :  { %v85_v48 = vsub.f32 1.5, %v84_v47 }
 0x10b   :  { %v237_v49 = vpop.eup %236 }
 0x10c   :  { %v94_v50 = vmul.f32 %v237_v49, %v80_v43  ;;  %v86_v51 = vmul.f32 %v235_v42, %v85_v48 }
 0x10e   :  { %v95_v52 = vmul.f32 %v237_v49, %v94_v50  ;;  %v87_v53 = vmul.f32 %v86_v51, %v79_v36 }
 0x110   :  { %v96_v55 = vmul.f32 0.5, %v95_v52  ;;  %v89_v56 = vsel %vm88_vm2, %v79_v36, %v87_v53 }
 0x111   :  { %v92_v57 = vsel %vm90_vm3, %v91_v54, %v89_v56 }
 0x112   :  { %v97_v58 = vsub.f32 1.5, %v96_v55  ;;  %v105_v59 = vadd.f32 1e-06, %v92_v57 }
 0x114   :  { %238 = vrcp.f32 %v105_v59  ;;  %v98_v60 = vmul.f32 %v237_v49, %v97_v58  ;;  %v118_v7 = vand.u32 2147483648, %v105_v59  ;;  %v116_v9 = vand.u32 2147483647, %v105_v59 }
 0x115   :  { %vm112_vm7 = vweird.f32 %v105_v59 }
 0x116   :  { %v99_v61 = vmul.f32 %v98_v60, %v80_v43  ;;  %v119_v12 = vor.u32 1.1754944e-38, %v118_v7  ;;  %vm117_vm9 = vcmp.eq.f32.partialorder %v116_v9, 8.507059e+37 }
 0x118   :  { %v101_v63 = vsel %vm100_vm4, %v80_v43, %v99_v61 }
 0x119   :  { %v104_v3 = vsel %vm102_vm5, %v103_v62, %v101_v63 }
 0x11a   :  { %v239_v2 = vpop.eup %238  ;;  %v106_v5 = vadd.f32 1e-06, %v104_v3 }
 0x11b   :  { %v108_v4 = vmul.f32 %v239_v2, %v105_v59  ;;  %vm113_vm6 = vweird.f32 %v239_v2 }
 0x11c   :  { %240 = vrcp.f32 %v106_v5  ;;  %vm114_vm8 = vmor %vm112_vm7, %vm113_vm6  ;;  %v133_v20 = vand.u32 2147483648, %v106_v5  ;;  %v131_v22 = vand.u32 2147483647, %v106_v5  ;;  %vm127_vm11 = vweird.f32 %v106_v5 }
 0x11d   :  { %v109_v6 = vsub.f32 1.0, %v108_v4 }
 0x11e   :  { %v134_v24 = vor.u32 1.1754944e-38, %v133_v20  ;;  %vm132_vm13 = vcmp.eq.f32.partialorder %v131_v22, 8.507059e+37 }
 0x11f   :  { %v110_v8 = vmul.f32 %v239_v2, %v109_v6 }
 0x121   :  { %v111_v10 = vadd.f32 %v239_v2, %v110_v8 }
 0x122   :  { %v241_v13 = vpop.eup %240 }
 0x123   :  { %v115_v14 = vsel %vm114_vm8, %v239_v2, %v111_v10  ;;  %v123_v17 = vmul.f32 %v241_v13, %v106_v5  ;;  %vm128_vm10 = vweird.f32 %v241_v13 }
 0x124   :  { %v120_v16 = vsel %vm117_vm9, %v119_v12, %v115_v14  ;;  %vm129_vm12 = vmor %vm127_vm11, %vm128_vm10 }
 0x125   :  { %v137_v18 = vmul.f32 %v120_v16, %v371_v11  ;;  %v124_v19 = vsub.f32 1.0, %v123_v17  ;;  %v229_v11 = vld [vmem:[%s396_s3] ss:$0 sm:$0xff] }
 0x127   :  { %175 = vmatmul.f32.vlgmr.msra.gmra.mxu0 %v137_v18  ;;  %v125_v21 = vmul.f32 %v241_v13, %v124_v19 }
 0x129   :  { %v126_v23 = vadd.f32 %v241_v13, %v125_v21 }
 0x12b   :  { %v130_v25 = vsel %vm129_vm12, %v241_v13, %v126_v23 }
 0x12c   :  { %v135_v26 = vsel %vm132_vm13, %v134_v24, %v130_v25 }
 0x12d   :  { %v138_v27 = vmul.f32 %v135_v26, %v376_v15 }
 0x12f   :  { %178 = vmatmul.f32.vlgmr.msra.gmra.mxu1 %v138_v27 }
 0x1a4   :  { %v176_v28 = vpop.f32.mrf.mxu0 }
 0x1a5   :  { %v177_v29 = vadd.f32 %v229_v11, %v176_v28 }
 0x1a7   :  { %v182_v30 = vadd.f32 %v177_v29, %v364_v0 }
 0x1a9   :  { %184 = vst [vmem:[#allocation9] sm:$0xff] %v182_v30 }
 0x1ac   :  { %v179_v31 = vpop.f32.mrf.mxu1 }
 0x1ad   :  { %v180_v32 = vadd.f32 %v229_v11, %v179_v31 }
 0x1af   :  { %v183_v15 = vadd.f32 %v180_v32, %v367_v1 }
 0x1b1   :  { %185 = vst [vmem:[#allocation9 + $0x8] sm:$0xff] %v183_v15 }
 0x1b2   :  { %198 = dma.vmem_to_hbm [thread:$0]  %s191_s27, 256, %s193_s30, [#allocation6], %s321_s22, %s321_s22, %s322_s23  }
 0x1b3   :  { %318 = dma.done.wait [#allocation6], 256  }
 0x1b4   :  { %319 = vsyncadd [#allocation6], 4294967040 }
 0x1b5   :  { %203 = vsyncpa [#allocation5], 1 }
 0x1b6   :  { %204 = vsyncpa [#allocation8], 1 }
 0x1b7   :  { %205 = vsyncpa [#allocation6], 1 }

</bundles_post_ra>
